<compile_context>
chip_gen: v7x
topology: tpu7x:2x2x1
jax: 0.10.0
libtpu: 0.0.40
codegen_flags: <defaults>
</compile_context>

<pallas_src>
import functools
import math
import random

import numpy as np
import jax
import jax.numpy as jnp
from jax.experimental import pallas as pl
from jax.experimental.pallas import tpu as pltpu


_MATMUL_IN_DTYPE = jnp.bfloat16     # MXU input dtype for A / B^T / x (accumulation f32)
_SMALL_PLANE = 64 * 64              # below this, a plain XLA einsum beats a pallas_call


# ----------------------------------------------------------------------------
# VMEM budgeting (generation aware)
# ----------------------------------------------------------------------------
@functools.lru_cache(maxsize=1)
def _vmem_limit_bytes():
    """Scoped-VMEM limit to request (v5e/v6e: 128 MiB physical, v7x: only 64 MiB)."""
    try:
        phys = int(pltpu.get_tpu_info().vmem_capacity_bytes)
    except Exception:
        phys = 64 * 1024 * 1024          # conservative (v7x-sized) fallback
    return max(16 * 1024 * 1024, min((phys * 3) // 4, 96 * 1024 * 1024))


def _pick_row_tile(hout):
    """Row tile for the hout grid axis: full for small images, bounded for large ones."""
    if hout <= 256:
        return hout
    for t in (256, 128, 64, 32, 16, 8):
        if hout % t == 0:
            return t
    return hout


# ----------------------------------------------------------------------------
# Pallas kernel: per (batch, channel-block, row-tile), out[c] = (A_tile @ X[c]) @ B^T
# ----------------------------------------------------------------------------
def _make_sep_kernel(c_blk):
    def kernel(a_ref, x_ref, bt_ref, o_ref):
        # a_ref:  (1, tm, hin)          bf16
        # x_ref:  (1, c_blk, hin, win)  caller dtype (resident across the row-tile axis)
        # bt_ref: (1, win, wout)        bf16
        # o_ref:  (1, c_blk, tm, wout)  caller dtype
        a = a_ref[0]                                   # (tm, hin) bf16
        btf = bt_ref[0].astype(jnp.float32)            # promote once; 2nd matmul stays f32
        for c in range(c_blk):                         # small static unroll (<= 16)
            xc = x_ref[0, c].astype(_MATMUL_IN_DTYPE)  # (hin, win)
            z = jnp.dot(a, xc, preferred_element_type=jnp.float32)        # (tm, win) f32
            o_ref[0, c] = jnp.dot(
                z, btf, preferred_element_type=jnp.float32).astype(o_ref.dtype)
    return kernel


@functools.lru_cache(maxsize=None)
def _build_sep_call(nb, nch, hin, win, hout, wout, c_blk, tm, out_dtype, vmem_limit):
    call = pl.pallas_call(
        _make_sep_kernel(c_blk),
        out_shape=jax.ShapeDtypeStruct((nb, nch, hout, wout), out_dtype),
        grid_spec=pltpu.PrefetchScalarGridSpec(
            num_scalar_prefetch=0,
            grid=(nb, nch // c_blk, hout // tm),
            in_specs=[
                pl.BlockSpec((1, tm, hin), lambda b, cb, ht: (b, ht, 0)),
                # x's block index ignores the row-tile axis -> kept resident (no re-fetch)
                pl.BlockSpec((1, c_blk, hin, win), lambda b, cb, ht: (b, cb, 0, 0)),
                pl.BlockSpec((1, win, wout), lambda b, cb, ht: (b, 0, 0)),
            ],
            out_specs=pl.BlockSpec((1, c_blk, tm, wout),
                                   lambda b, cb, ht: (b, cb, ht, 0)),
        ),
        compiler_params=pltpu.CompilerParams(
            dimension_semantics=("parallel", "parallel", "parallel"),
            vmem_limit_bytes=int(vmem_limit)),
    )
    return jax.jit(call)


def sep_transform(x, a_mat, bt_mat, *, force_pallas=False):
    """out[b, c] = A[b] @ x[b, c] @ Bt[b]       (Bt is already B^T).

    a_mat:  (hout, hin)  or (B, hout, hin)   -- 2-D when shared across the batch
    bt_mat: (win, wout)  or (B, win, wout)
    """
    x = jnp.asarray(x)
    bsz, cch, hin, win = map(int, x.shape)
    a = jnp.asarray(a_mat)
    bt = jnp.asarray(bt_mat)
    shared = (a.ndim == 2) and (bt.ndim == 2)
    hout = int(a.shape[-2])
    wout = int(bt.shape[-1])

    # Tiny planes (e.g. the 8x8/16x16/64x64 fake scales): launch + DMA-setup overhead
    # dominates and lanes would be mostly masked -> let XLA handle them.
    if (hin * win <= _SMALL_PLANE or hout * wout <= _SMALL_PLANE) and not force_pallas:
        af, btf, xf = a.astype(jnp.float32), bt.astype(jnp.float32), x.astype(jnp.float32)
        if shared:
            out = jnp.einsum('hi,bciw,wo->bcho', af, xf, btf)
        else:
            out = jnp.einsum('bhi,bciw,bwo->bcho', af, xf, btf)
        return out.astype(x.dtype)

    # Shared matrices -> merge batch into the channel axis: fewer, larger grid steps.
    if shared:
        xk = x.reshape(1, bsz * cch, hin, win)
        a3, bt3 = a[None], bt[None]
    else:
        xk = x
        a3, bt3 = a, bt
    nb, nch = int(xk.shape[0]), int(xk.shape[1])

    # A / B^T travel as bf16; accumulation is f32 and the intermediate stays f32.
    a3 = a3.astype(_MATMUL_IN_DTYPE)
    bt3 = bt3.astype(_MATMUL_IN_DTYPE)

    tm = _pick_row_tile(hout)
    vmem_limit = _vmem_limit_bytes()
    budget = vmem_limit // 2
    x_item = x.dtype.itemsize

    def est(cb):  # per-grid-step VMEM estimate, incl. double buffering + in-kernel temps
        blocks = (cb * hin * win * x_item * 2      # x block (double-buffered)
                  + cb * tm * wout * x_item * 2    # out block (double-buffered)
                  + tm * hin * 2 * 2               # A tile (bf16, double-buffered)
                  + win * wout * 2 * 2)            # B^T (bf16, double-buffered)
        temps = (hin * win * 2                     # one channel's bf16 copy of x
                 + tm * win * 4                    # z (f32)
                 + win * wout * 4                  # B^T promoted to f32
                 + tm * wout * 4)                  # result before store (f32)
        return blocks + 2 * temps                  # slack for compiler scratch

    c_blk = 1
    for d in range(1, nch + 1):
        if nch % d == 0 and d <= 16 and est(d) <= budget:
            c_blk = d

    call = _build_sep_call(nb, nch, hin, win, hout, wout, c_blk, tm,
                           np.dtype(x.dtype), int(vmem_limit))
    out = call(a3, xk, bt3)
    if shared:
        out = out.reshape(bsz, cch, hout, wout)
    return out


# ----------------------------------------------------------------------------
# Host-side interpolation / crop / flip matrices (cached)
# ----------------------------------------------------------------------------
_MAT_CACHE = {}


def resize_matrix(out_size, in_size, crop_start=0, crop_size=None):
    """(out_size, in_size) matrix implementing [crop -> bilinear resize], matching
    torch.nn.functional.interpolate(mode='bilinear', align_corners=False)."""
    if crop_size is None:
        crop_size = in_size
    key = ("resize", out_size, in_size, crop_start, crop_size)
    m = _MAT_CACHE.get(key)
    if m is None:
        m = np.zeros((out_size, in_size), dtype=np.float32)
        o = np.arange(out_size, dtype=np.float64)
        scale = crop_size / out_size
        src = (o + 0.5) * scale - 0.5
        src = np.maximum(src, 0.0)
        i0 = np.minimum(np.floor(src).astype(np.int64), crop_size - 1)
        i1 = np.minimum(i0 + 1, crop_size - 1)
        lam = (src - i0).astype(np.float32)
        rows = np.arange(out_size)
        m[rows, crop_start + i0] += (1.0 - lam)
        m[rows, crop_start + i1] += lam
        _MAT_CACHE[key] = m
    return m


def flip_matrix(n):
    key = ("flip", n)
    m = _MAT_CACHE.get(key)
    if m is None:
        m = np.ascontiguousarray(np.eye(n, dtype=np.float32)[::-1])
        _MAT_CACHE[key] = m
    return m


# ----------------------------------------------------------------------------
# The augmentation pipe
# ----------------------------------------------------------------------------
class AugmentPipeKorniaNew:
    def __init__(self, prob, use_masks, seed=0):
        self.prob = prob
        self.use_masks = use_masks
        self._rng = random.Random(seed)   # deterministic stand-in for random.random()

    def __call__(self, batch):
        images = [jnp.asarray(im) for im in batch['images']]   # list of (B, 3, h_j, w_j)
        bsz, _, H, W = map(int, images[-1].shape)

        # ---- sample every random stage on host; compose per-batch (H,H)/(W,W) matrices
        A_list = [np.eye(H, dtype=np.float64) for _ in range(bsz)]
        B_list = [np.eye(W, dtype=np.float64) for _ in range(bsz)]
        batch_varying = False

        def compose(a_stage, b_stage):
            for i in range(bsz):
                A_list[i] = np.asarray(a_stage[i], np.float64) @ A_list[i]
                B_list[i] = np.asarray(b_stage[i], np.float64) @ B_list[i]

        # ---------------- RandomCrop(r in [0.85, 1.0]) + bilinear resize back to (H, W)
        if self._rng.random() < self.prob:
            batch_varying = True
            r = self._rng.random() * 0.15 + 0.85
            ch_, cw_ = int(H * r), int(W * r)
            a_st, b_st = [], []
            for _ in range(bsz):
                top = self._rng.randint(0, H - ch_)
                left = self._rng.randint(0, W - cw_)
                a_st.append(resize_matrix(H, H, crop_start=top, crop_size=ch_))
                b_st.append(resize_matrix(W, W, crop_start=left, crop_size=cw_))
            compose(a_st, b_st)

        # TODO(synk): kornia RandomRotation(45) + CenterCrop is a non-separable 2-D warp; not implemented.
        if self._rng.random() < self.prob:
            pass

        # ---------------- RandomHorizontalFlip(p=1.0)
        if self._rng.random() < self.prob:
            compose([np.eye(H, dtype=np.float64)] * bsz, [flip_matrix(W)] * bsz)

        # ---------------- RandomVerticalFlip(p=1.0)
        if self._rng.random() < self.prob:
            compose([flip_matrix(H)] * bsz, [np.eye(W, dtype=np.float64)] * bsz)

        # ---------------- RandomResizedCrop(scale=(0.8, 1.0), ratio=(0.7, 1.3))
        if self._rng.random() < self.prob:
            batch_varying = True
            a_st, b_st = [], []
            for _ in range(bsz):
                ch_, cw_ = H, W
                for _try in range(10):
                    area = H * W * self._rng.uniform(0.8, 1.0)
                    ar = math.exp(self._rng.uniform(math.log(0.7), math.log(1.3)))
                    tw = int(round(math.sqrt(area * ar)))
                    th = int(round(math.sqrt(area / ar)))
                    if 0 < tw <= W and 0 < th <= H:
                        ch_, cw_ = th, tw
                        break
                top = self._rng.randint(0, H - ch_)
                left = self._rng.randint(0, W - cw_)
                a_st.append(resize_matrix(H, H, crop_start=top, crop_size=ch_))
                b_st.append(resize_matrix(W, W, crop_start=left, crop_size=cw_))
            compose(a_st, b_st)

        # ColorJitter branch is dead in the reference (`... and 0`): draw consumed, never applied.
        _ = self._rng.random()

        # TODO(synk): kornia RandomPerspective is a non-separable 2-D warp; not implemented.
        if self._rng.random() < self.prob:
            pass

        A_aug = np.stack(A_list, axis=0)          # (B, H, H)
        B_aug = np.stack(B_list, axis=0)          # (B, W, W)

        # ---- pre-compose & upload every per-scale matrix BEFORE the first kernel launch
        #      out_j = (Rdown_j @ A_aug @ Rup_j) @ X_j @ (Rdown_j @ B_aug @ Rup_j)^T
        mats = []
        for xj in images:
            hj, wj = int(xj.shape[2]), int(xj.shape[3])
            up_h = resize_matrix(H, hj).astype(np.float64)      # combine_fakes
            up_w = resize_matrix(W, wj).astype(np.float64)
            down_h = resize_matrix(hj, H).astype(np.float64)    # detach_fakes
            down_w = resize_matrix(wj, W).astype(np.float64)
            A_tot = down_h @ A_aug @ up_h                               # (B, hj, hj)
            Bt_tot = np.transpose(down_w @ B_aug @ up_w, (0, 2, 1))     # (B, wj, wj) = B^T
            if not batch_varying:
                A_tot, Bt_tot = A_tot[0], Bt_tot[0]                     # shared -> un-batched
            mats.append((jnp.asarray(A_tot.astype(np.float32)),
                         jnp.asarray(Bt_tot.astype(np.float32))))

        if self.use_masks:
            A_m = A_aug
            Bt_m = np.transpose(B_aug, (0, 2, 1))
            if not batch_varying:
                A_m, Bt_m = A_m[0], Bt_m[0]
            mask_mats = (jnp.asarray(A_m.astype(np.float32)),
                         jnp.asarray(Bt_m.astype(np.float32)))

        # ---- ONE fused transform per scale (Pallas for real scales, XLA for tiny ones)
        batch['images'] = [sep_transform(xj, aj, btj)
                           for xj, (aj, btj) in zip(images, mats)]

        # ---- mask: equivalent to appending mask channel-groups to the full-res stack,
        #      augmenting them identically, and stripping them back (one fused call).
        if self.use_masks:
            mask = jnp.asarray(batch['masks'])
            batch['masks'] = sep_transform(mask, mask_mats[0], mask_mats[1])

        return batch


# ----------------------------------------------------------------------------
if __name__ == "__main__":
    key = jax.random.PRNGKey(0)
    k1, k2, k3, k4 = jax.random.split(key, 4)

    # ---- numerical self-checks of the fused Pallas kernel vs an f32 XLA reference ----
    H = W = 128
    xt = jax.random.normal(k1, (2, 3, H, W), dtype=jnp.float32)

    # batched (per-image) matrices
    At = np.stack([resize_matrix(H, H, 7, 112), flip_matrix(H)]).astype(np.float32)
    Bt_ = np.transpose(np.stack([flip_matrix(W), resize_matrix(W, W, 3, 120)]),
                       (0, 2, 1)).astype(np.float32)
    got = sep_transform(xt, At, Bt_, force_pallas=True)
    ref = jnp.einsum('bhi,bciw,bwo->bcho', jnp.asarray(At), xt, jnp.asarray(Bt_),
                     precision=jax.lax.Precision.HIGHEST)
    assert bool(jnp.allclose(got, ref, atol=4e-2, rtol=4e-2)), "batched kernel self-check failed"

    # shared matrices (exercises the merged batch*channel path)
    As = (flip_matrix(H) @ resize_matrix(H, H, 5, 100)).astype(np.float32)
    Bs = np.ascontiguousarray(resize_matrix(W, W, 9, 110).T).astype(np.float32)
    got_s = sep_transform(xt, As, Bs, force_pallas=True)
    ref_s = jnp.einsum('hi,bciw,wo->bcho', jnp.asarray(As), xt, jnp.asarray(Bs),
                       precision=jax.lax.Precision.HIGHEST)
    assert bool(jnp.allclose(got_s, ref_s, atol=4e-2, rtol=4e-2)), "shared kernel self-check failed"

    # ---- run the full pipe: multi-scale fake images (NCHW) + masks ----
    bsz = 2
    images = [
        jax.random.normal(k2, (bsz, 3, 64, 64), dtype=jnp.float32),    # tiny scale -> XLA path
        jax.random.normal(k3, (bsz, 3, 128, 128), dtype=jnp.float32),  # full scale -> Pallas
    ]
    masks = jax.random.uniform(k4, (bsz, 3, 128, 128), dtype=jnp.float32)
    batch = {'images': images, 'masks': masks}

    pipe = AugmentPipeKorniaNew(prob=1.0, use_masks=True, seed=0)
    out = pipe(batch)

    for t in out['images']:
        jax.block_until_ready(t)
    jax.block_until_ready(out['masks'])

    assert out['images'][0].shape == (bsz, 3, 64, 64)
    assert out['images'][1].shape == (bsz, 3, 128, 128)
    assert out['masks'].shape == (bsz, 3, 128, 128)
    assert all(bool(jnp.all(jnp.isfinite(t))) for t in out['images'])
    assert bool(jnp.all(jnp.isfinite(out['masks'])))

    print("KERNEL_OK")
</pallas_src>

<mosaic_0001>
module attributes {stable_mosaic.version = 11 : i64} {
  func.func @kernel(%arg0: i32, %arg1: i32, %arg2: i32, %arg3: memref<1x128x128xbf16, #tpu.memory_space<vmem>>, %arg4: memref<1x3x128x128xf32, #tpu.memory_space<vmem>>, %arg5: memref<1x128x128xbf16, #tpu.memory_space<vmem>>, %arg6: memref<1x3x128x128xf32, #tpu.memory_space<vmem>>) attributes {dimension_semantics = [#tpu.dimension_semantics<parallel>, #tpu.dimension_semantics<parallel>, #tpu.dimension_semantics<parallel>], iteration_bounds = array<i64: 2, 1, 1>, scalar_prefetch = 0 : i64, scratch_operands = 0 : i64, tpu.core_type = #tpu.core_type<tc>, window_params = [{transform_indices = @transform_0, window_bounds = array<i64: 1, 128, 128>}, {transform_indices = @transform_1, window_bounds = array<i64: 1, 3, 128, 128>}, {transform_indices = @transform_2, window_bounds = array<i64: 1, 128, 128>}, {transform_indices = @transform_3, window_bounds = array<i64: 1, 3, 128, 128>}]} {
    %c0 = arith.constant 0 : index
    %c0_0 = arith.constant 0 : index
    %c0_1 = arith.constant 0 : index
    %0 = vector.load %arg3[%c0, %c0_0, %c0_1] : memref<1x128x128xbf16, #tpu.memory_space<vmem>>, vector<1x128x128xbf16>
    %1 = vector.shape_cast %0 : vector<1x128x128xbf16> to vector<128x128xbf16>
    %c0_2 = arith.constant 0 : index
    %c0_3 = arith.constant 0 : index
    %c0_4 = arith.constant 0 : index
    %2 = vector.load %arg5[%c0_2, %c0_3, %c0_4] : memref<1x128x128xbf16, #tpu.memory_space<vmem>>, vector<1x128x128xbf16>
    %3 = vector.shape_cast %2 : vector<1x128x128xbf16> to vector<128x128xbf16>
    %4 = arith.extf %3 : vector<128x128xbf16> to vector<128x128xf32>
    %c0_5 = arith.constant 0 : index
    %c0_6 = arith.constant 0 : index
    %c0_7 = arith.constant 0 : index
    %c0_8 = arith.constant 0 : index
    %5 = vector.load %arg4[%c0_5, %c0_6, %c0_7, %c0_8] : memref<1x3x128x128xf32, #tpu.memory_space<vmem>>, vector<1x1x128x128xf32>
    %6 = vector.shape_cast %5 : vector<1x1x128x128xf32> to vector<128x128xf32>
    %7 = arith.truncf %6 : vector<128x128xf32> to vector<128x128xbf16>
    %cst = arith.constant dense<0.000000e+00> : vector<128x128xf32>
    %8 = tpu.matmul %1, %7, %cst {dimension_numbers = #tpu.dot_dimension_numbers<[1], [0], [0], [1], [0, 0, 1, 1], [], []>} : vector<128x128xbf16>, vector<128x128xbf16>, vector<128x128xf32> -> vector<128x128xf32>
    %cst_9 = arith.constant dense<0.000000e+00> : vector<128x128xf32>
    %9 = tpu.matmul %8, %4, %cst_9 {dimension_numbers = #tpu.dot_dimension_numbers<[1], [0], [0], [1], [0, 0, 1, 1], [], []>} : vector<128x128xf32>, vector<128x128xf32>, vector<128x128xf32> -> vector<128x128xf32>
    %c0_10 = arith.constant 0 : index
    %c0_11 = arith.constant 0 : index
    %c0_12 = arith.constant 0 : index
    %c0_13 = arith.constant 0 : index
    %10 = vector.load %arg6[%c0_10, %c0_11, %c0_12, %c0_13] : memref<1x3x128x128xf32, #tpu.memory_space<vmem>>, vector<1x1x128x128xf32>
    %11 = vector.shape_cast %10 : vector<1x1x128x128xf32> to vector<128x128xf32>
    %12 = vector.shape_cast %9 : vector<128x128xf32> to vector<1x1x128x128xf32>
    tpu.vector_store %arg6[%c0_10, %c0_11, %c0_12, %c0_13], %12 {strides = array<i32>} : memref<1x3x128x128xf32, #tpu.memory_space<vmem>>, vector<1x1x128x128xf32>,
    %c0_14 = arith.constant 0 : index
    %c1 = arith.constant 1 : index
    %c0_15 = arith.constant 0 : index
    %c0_16 = arith.constant 0 : index
    %13 = vector.load %arg4[%c0_14, %c1, %c0_15, %c0_16] : memref<1x3x128x128xf32, #tpu.memory_space<vmem>>, vector<1x1x128x128xf32>
    %14 = vector.shape_cast %13 : vector<1x1x128x128xf32> to vector<128x128xf32>
    %15 = arith.truncf %14 : vector<128x128xf32> to vector<128x128xbf16>
    %cst_17 = arith.constant dense<0.000000e+00> : vector<128x128xf32>
    %16 = tpu.matmul %1, %15, %cst_17 {dimension_numbers = #tpu.dot_dimension_numbers<[1], [0], [0], [1], [0, 0, 1, 1], [], []>} : vector<128x128xbf16>, vector<128x128xbf16>, vector<128x128xf32> -> vector<128x128xf32>
    %cst_18 = arith.constant dense<0.000000e+00> : vector<128x128xf32>
    %17 = tpu.matmul %16, %4, %cst_18 {dimension_numbers = #tpu.dot_dimension_numbers<[1], [0], [0], [1], [0, 0, 1, 1], [], []>} : vector<128x128xf32>, vector<128x128xf32>, vector<128x128xf32> -> vector<128x128xf32>
    %c0_19 = arith.constant 0 : index
    %c1_20 = arith.constant 1 : index
    %c0_21 = arith.constant 0 : index
    %c0_22 = arith.constant 0 : index
    %18 = vector.load %arg6[%c0_19, %c1_20, %c0_21, %c0_22] : memref<1x3x128x128xf32, #tpu.memory_space<vmem>>, vector<1x1x128x128xf32>
    %19 = vector.shape_cast %18 : vector<1x1x128x128xf32> to vector<128x128xf32>
    %20 = vector.shape_cast %17 : vector<128x128xf32> to vector<1x1x128x128xf32>
    tpu.vector_store %arg6[%c0_19, %c1_20, %c0_21, %c0_22], %20 {strides = array<i32>} : memref<1x3x128x128xf32, #tpu.memory_space<vmem>>, vector<1x1x128x128xf32>,
    %c0_23 = arith.constant 0 : index
    %c2 = arith.constant 2 : index
    %c0_24 = arith.constant 0 : index
    %c0_25 = arith.constant 0 : index
    %21 = vector.load %arg4[%c0_23, %c2, %c0_24, %c0_25] : memref<1x3x128x128xf32, #tpu.memory_space<vmem>>, vector<1x1x128x128xf32>
    %22 = vector.shape_cast %21 : vector<1x1x128x128xf32> to vector<128x128xf32>
    %23 = arith.truncf %22 : vector<128x128xf32> to vector<128x128xbf16>
    %cst_26 = arith.constant dense<0.000000e+00> : vector<128x128xf32>
    %24 = tpu.matmul %1, %23, %cst_26 {dimension_numbers = #tpu.dot_dimension_numbers<[1], [0], [0], [1], [0, 0, 1, 1], [], []>} : vector<128x128xbf16>, vector<128x128xbf16>, vector<128x128xf32> -> vector<128x128xf32>
    %cst_27 = arith.constant dense<0.000000e+00> : vector<128x128xf32>
    %25 = tpu.matmul %24, %4, %cst_27 {dimension_numbers = #tpu.dot_dimension_numbers<[1], [0], [0], [1], [0, 0, 1, 1], [], []>} : vector<128x128xf32>, vector<128x128xf32>, vector<128x128xf32> -> vector<128x128xf32>
    %c0_28 = arith.constant 0 : index
    %c2_29 = arith.constant 2 : index
    %c0_30 = arith.constant 0 : index
    %c0_31 = arith.constant 0 : index
    %26 = vector.load %arg6[%c0_28, %c2_29, %c0_30, %c0_31] : memref<1x3x128x128xf32, #tpu.memory_space<vmem>>, vector<1x1x128x128xf32>
    %27 = vector.shape_cast %26 : vector<1x1x128x128xf32> to vector<128x128xf32>
    %28 = vector.shape_cast %25 : vector<128x128xf32> to vector<1x1x128x128xf32>
    tpu.vector_store %arg6[%c0_28, %c2_29, %c0_30, %c0_31], %28 {strides = array<i32>} : memref<1x3x128x128xf32, #tpu.memory_space<vmem>>, vector<1x1x128x128xf32>,
    return
  }
  func.func @transform_0(%arg0: i32, %arg1: i32, %arg2: i32) -> (i32, i32, i32) {
    %c0_i32 = arith.constant 0 : i32
    %c0_i32_0 = arith.constant 0 : i32
    return %arg0, %arg2, %c0_i32 : i32, i32, i32
  }
  func.func @transform_1(%arg0: i32, %arg1: i32, %arg2: i32) -> (i32, i32, i32, i32) {
    %c0_i32 = arith.constant 0 : i32
    %c0_i32_0 = arith.constant 0 : i32
    %c0_i32_1 = arith.constant 0 : i32
    return %arg0, %arg1, %c0_i32, %c0_i32_0 : i32, i32, i32, i32
  }
  func.func @transform_2(%arg0: i32, %arg1: i32, %arg2: i32) -> (i32, i32, i32) {
    %c0_i32 = arith.constant 0 : i32
    %c0_i32_0 = arith.constant 0 : i32
    %c0_i32_1 = arith.constant 0 : i32
    return %arg0, %c0_i32, %c0_i32_0 : i32, i32, i32
  }
  func.func @transform_3(%arg0: i32, %arg1: i32, %arg2: i32) -> (i32, i32, i32, i32) {
    %c0_i32 = arith.constant 0 : i32
    %c0_i32_0 = arith.constant 0 : i32
    return %arg0, %arg1, %arg2, %c0_i32 : i32, i32, i32, i32
  }
}

</mosaic_0001>

<bundles_post_ra>
// kernel: tpu_custom_call.1
= control target key start
LH: loop header
LB: loop body
LE: loop exit
PB: predicated region body
PF: predicated region fallthrough
CT: control target
= control target key end

     0   :  { %s2842_s0 = inlined_call_operand.hbm [shape: bf16[2,128,128], index: 0, kind: input, shape index: {}]   ;;  %s2843_s1 = inlined_call_operand.hbm [shape: f32[2,3,128,128], index: 1, kind: input, shape index: {}]   ;;  %s2844_s2 = inlined_call_operand.hbm [shape: bf16[2,128,128], index: 2, kind: input, shape index: {}]   ;;  %s2845_s3 = inlined_call_operand.hbm [shape: f32[2,3,128,128], index: 3, kind: output, shape index: {}]  }
   0x1   :  { %2850 = sst [smem:[#allocation13_spill]] %s2842_s0 }
   0x2   :  { %2851 = sst [smem:[#allocation14_spill]] %s2843_s1 }
   0x3   :  { %8 = vsyncpa [#allocation3], 0 }
   0x4   :  { %10 = vsyncpa [#allocation3 + $0x1], 0 }
   0x5   :  { %11 = vsyncpa [#allocation6], 0 }
   0x6   :  { %13 = vsyncpa [#allocation6 + $0x1], 0 }
   0x7   :  { %14 = vsyncpa [#allocation4], 0 }
   0x8   :  { %16 = vsyncpa [#allocation4 + $0x1], 0  ;;  %s2338_s12 = smov 0   ;;  %s2340_s13 = smov 0  }
   0x9   :  { %s2342_s14 = smov 0   ;;  %s2344_s15 = smov 0  }
   0xa   :  { %s2346_s16 = smov 0   ;;  %s2348_s17 = smov 0  }
   0xb LB: > { %s2369_s18 = sadd.s32 4294967295, %s2306_s17   ;;  %s1407_s19 = sadd.s32 4294967294, %s2306_s17   ;;  %s2306_s17 = sphi %s2348_s17, %s22_s17   ;;  %s2302_s16 = sphi %s2346_s16, %s2873_s16   ;;  %s2298_s15 = sphi %s2344_s15, %s2872_s15   ;;  %s2294_s14 = sphi %s2342_s14, %s2871_s14   ;;  %s2290_s13 = sphi %s2340_s13, %s2870_s13   ;;  %s2286_s12 = sphi %s2338_s12, %s2869_s12  }
   0xc   : > { %s41_s20 = sadd.s32 1, %s2302_s16  ;;  %s50_s21 = sadd.s32 1, %s2294_s14 }
   0xd   : > { %p43_p0 = scmp.ge.s32.totalorder %s41_s20, 2  ;;  %p57_p1 = scmp.ne.s32.totalorder %s2294_s14, %s2290_s13 }
   0xe   : > { %p58_p2 = scmp.eq.s32.totalorder %s2306_s17, 0  ;;  %p63_p3 = scmp.ne.s32.totalorder %s2290_s13, %s2286_s12 }
   0xf   : > { %s2875_s20 = smov (%p43_p0, %s41_s20), 0  ;;  %p64_p5 = scmp.eq.s32.totalorder %s2369_s18, 0 }
  0x10   : > { %2852 = sst [smem:[#allocation12_spill]] %s2875_s20  ;;  %p2381_p4 = por %p58_p2, %p57_p1 }
  0x11   : > { %s45_s23 = ssub.s32 %s2302_s16, %s2875_s20  ;;  %p145_p6 = scmp.eq.s32.totalorder %s2369_s18, 1 }
  0x12   : > { %p48_p7 = scmp.eq.s32.totalorder %s45_s23, 0  ;;  %p2389_p8 = por %p64_p5, %p63_p3 }
  0x13   : > { %p2393_p9 = por %p145_p6, %p57_p1  ;;  %p151_p10 = scmp.eq.s32.totalorder %s1407_s19, 1 }
  0x14   : > { %s2854_s24 = scalar_select %p2389_p8, 1, 0 }
  0x15   : > { %s2855_s25 = scalar_select %p2393_p9, 1, 0 }
  0x16   : > { %s2398_s26 = scalar_select %p48_p7, %s2294_s14, %s50_s21  }
  0x17   : > { %p2400_p11 = por %p151_p10, %p63_p3  ;;  %p2066_p13 = scmp.lt.s32.totalorder %s2306_s17, 2 }
  0x18   : > { %s2407_s28 = sand.u32 1, %s2294_s14   ;;  %s194_s29 = sand.u32 1, %s2306_s17  }
  0x19   : > { %s2856_s27 = scalar_select %p2400_p11, 1, 0 }
  0x1a   : > { %s2040_s30 = smul.u32 384, %s2407_s28  ;;  %p2413_p0 = pnand %p2066_p13, %p2381_p4 }
  0x1b   : > { %s2041_s5 = smul.u32 6144, %s2302_s16  ;;  %s2858_s1 = sld [smem:[#allocation14_spill]] }
  0x1c   : > { %s198_s6 = scalar_lea.vmem [#allocation5], %s2040_s30  ;;  %s2425_s11 = scalar_lea.sflag [#allocation6], %s194_s29 }
  0x1d   : > { %s208_s7 = sshll.u32 %s198_s6, 4  ;;  %p2431_p2 = pneg %p2413_p0  ;;  %s2423_s7 = int_to_ptr.vmem [resolvable:$true] %s208_s7 }
  0x21   : > { %s2421_s10 = scalar_lea.hbm %s2858_s1, %s2041_s5  ;;  %s2135_s30 = scalar_lea.hbm %s2858_s1, 12288 }
  0x22   : > { %s2130_s19 = scalar_lea.hbm %s2421_s10, 6144  ;;  %p2136_p5 = scmp.lt.u32.totalorder %s2421_s10, %s2858_s1 }
  0x23   : > { %p2131_p1 = scmp.ne.s32.totalorder %s2421_s10, %s2130_s19  ;;  %p2137_p6 = scmp.lt.u32.totalorder %s2135_s30, %s2130_s19 }
  0x24   : > { %p2139_p10 = scmp.lt.u32.totalorder %s2130_s19, %s2421_s10 }
  0x25   : > { %p2133_p3 = pnand %p2431_p2, %p2131_p1  ;;  %p2138_p7 = por %p2137_p6, %p2136_p5 }
  0x27   : > { %p2134_p4 = pneg %p2133_p3  ;;  %p2140_p13 = por %p2139_p10, %p2138_p7 }
  0x29   : > { %p2141_p12 = pnand %p2140_p13, %p2134_p4 }
  0x2b   : > { %2144 = shalt.err (!%p2141_p12)
}
  0x2c   : > { %s2145_s29 = scalar_lea.vmem %s2423_s7, 6144  ;;  %s2308_s8 = smov [#allocation5]  }
  0x2d   : > { %p2146_p1 = scmp.ne.s32.totalorder %s2423_s7, %s2145_s29  ;;  %s2150_s9 = sshll.u32 %s2308_s8, 4  ;;  %s2151_s9 = int_to_ptr.vmem [resolvable:$false] %s2150_s9 }
  0x2e   : > { %s2152_s22 = scalar_lea.vmem %s2151_s9, 12288  ;;  %p2153_p9 = scmp.lt.s32.totalorder %s2423_s7, %s2151_s9 }
  0x2f   : > { %p2148_p3 = pnand %p2146_p1, %p2431_p2  ;;  %p2154_p8 = scmp.lt.s32.totalorder %s2152_s22, %s2145_s29 }
  0x31   : > { %p2149_p11 = pneg %p2148_p3  ;;  %p2155_p5 = por %p2154_p8, %p2153_p9 }
  0x33   : > { %p2156_p6 = pnand %p2155_p5, %p2149_p11 }
  0x35   : > { %2159 = shalt.err (!%p2156_p6)
}
  0x36   : > { %s2309_s19 = smov 128   ;;  %s2310_s23 = smov 8  }
  0x37   : > { %2058 = dma.hbm_to_vmem [thread:$0]  (!%p2413_p0), %s2421_s10, 6144, %s2423_s7, %s2425_s11, %s2309_s19, %s2309_s19, %s2310_s23  }
  0x38   : > { %p1417_p12 = scmp.ge.s32.totalorder %s2306_s17, 1  ;;  %p237_p8 = scmp.lt.s32.totalorder %s2306_s17, 3 }
  0x39   : > { %s1410_s5 = sshll.u32 %s2407_s28, 6  ;;  %s2848_s6 = sshll.u32 %s2302_s16, 10 }
  0x3a   : > { %p2457_p9 = pnand %p1417_p12, %p237_p8  ;;  %s2861_s0 = sld [smem:[#allocation13_spill]] }
  0x3b   : > { %s175_s7 = scalar_lea.vmem [#allocation2], %s1410_s5  ;;  %s172_s22 = scalar_lea.sflag [#allocation3], %s2407_s28 }
  0x3c   : > { %s2860_s30 = scalar_select %p2457_p9, 1, 0 }
  0x3d   : > { %s184_s10 = sshll.u32 %s175_s7, 4  ;;  %s2472_s10 = int_to_ptr.vmem [resolvable:$true] %s184_s10 }
  0x40   : > { %s2468_s9 = scalar_lea.hbm %s2861_s0, %s2848_s6  ;;  %s2165_s29 = scalar_lea.hbm %s2861_s0, 2048 }
  0x41   : > { %s2160_s19 = scalar_lea.hbm %s2468_s9, 1024  ;;  %p2166_p10 = scmp.lt.u32.totalorder %s2468_s9, %s2861_s0 }
  0x42   : > { %p2161_p11 = scmp.ne.s32.totalorder %s2468_s9, %s2160_s19  ;;  %p2167_p13 = scmp.lt.u32.totalorder %s2165_s29, %s2160_s19 }
  0x43   : > { %p2169_p3 = scmp.lt.u32.totalorder %s2160_s19, %s2468_s9 }
  0x44   : > { %p2163_p4 = pnand %p2161_p11, %p2431_p2  ;;  %p2168_p1 = por %p2167_p13, %p2166_p10 }
  0x46   : > { %p2164_p7 = pneg %p2163_p4  ;;  %p2170_p5 = por %p2169_p3, %p2168_p1 }
  0x48   : > { %p2171_p6 = pnand %p2170_p5, %p2164_p7 }
  0x4a   : > { %2174 = shalt.err (!%p2171_p6)
}
  0x4b   : > { %s2175_s7 = scalar_lea.vmem %s2472_s10, 1024  ;;  %s2311_s1 = smov [#allocation2]  }
  0x4c   : > { %p2176_p12 = scmp.ne.s32.totalorder %s2472_s10, %s2175_s7  ;;  %s2180_s23 = sshll.u32 %s2311_s1, 4  ;;  %s2181_s23 = int_to_ptr.vmem [resolvable:$false] %s2180_s23 }
  0x4d   : > { %s2182_s6 = scalar_lea.vmem %s2181_s23, 2048  ;;  %p2183_p4 = scmp.lt.s32.totalorder %s2472_s10, %s2181_s23 }
  0x4e   : > { %p2178_p8 = pnand %p2176_p12, %p2431_p2  ;;  %p2184_p9 = scmp.lt.s32.totalorder %s2182_s6, %s2175_s7 }
  0x50   : > { %p2179_p11 = pneg %p2178_p8  ;;  %p2185_p10 = por %p2184_p9, %p2183_p4 }
  0x52   : > { %p2186_p13 = pnand %p2185_p10, %p2179_p11 }
  0x54   : > { %2189 = shalt.err (!%p2186_p13)
}
  0x55   : > { %s2312_s19 = smov 64   ;;  %s2313_s29 = smov 4  }
  0x56   : > { %2055 = dma.hbm_to_vmem [thread:$0]  (!%p2413_p0), %s2468_s9, 1024, %s2472_s10, %s172_s22, %s2312_s19, %s2312_s19, %s2313_s29  }
  0x57   : > { %s2862_s8 = sshll.u32 %s2302_s16, 10  ;;  %s222_s6 = scalar_lea.vmem [#allocation7], %s1410_s5 }
  0x58   : > { %s2506_s23 = scalar_lea.hbm %s2844_s2, %s2862_s8  ;;  %s229_s0 = sshll.u32 %s222_s6, 4  ;;  %s2510_s0 = int_to_ptr.vmem [resolvable:$true] %s229_s0 }
  0x59   : > { %s2190_s20 = scalar_lea.hbm %s2506_s23, 1024  ;;  %s2195_s22 = scalar_lea.hbm %s2844_s2, 2048 }
  0x5a   : > { %p2191_p9 = scmp.ne.s32.totalorder %s2506_s23, %s2190_s20  ;;  %p2196_p3 = scmp.lt.u32.totalorder %s2506_s23, %s2844_s2 }
  0x5b   : > { %p2197_p5 = scmp.lt.u32.totalorder %s2195_s22, %s2190_s20  ;;  %p2199_p12 = scmp.lt.u32.totalorder %s2190_s20, %s2506_s23 }
  0x5c   : > { %p2193_p7 = pnand %p2191_p9, %p2431_p2 }
  0x5d   : > { %p2198_p6 = por %p2197_p5, %p2196_p3 }
  0x5e   : > { %p2194_p1 = pneg %p2193_p7 }
  0x5f   : > { %p2200_p8 = por %p2199_p12, %p2198_p6 }
  0x61   : > { %p2201_p11 = pnand %p2200_p8, %p2194_p1 }
  0x63   : > { %2204 = shalt.err (!%p2201_p11)
}
  0x64   : > { %s2205_s28 = scalar_lea.vmem %s2510_s0, 1024  ;;  %s2314_s5 = smov [#allocation7]  }
  0x65   : > { %p2206_p4 = scmp.ne.s32.totalorder %s2510_s0, %s2205_s28  ;;  %s2210_s1 = sshll.u32 %s2314_s5, 4  ;;  %s2211_s1 = int_to_ptr.vmem [resolvable:$false] %s2210_s1 }
  0x66   : > { %s2212_s6 = scalar_lea.vmem %s2211_s1, 2048  ;;  %p2213_p9 = scmp.lt.s32.totalorder %s2510_s0, %s2211_s1 }
  0x67   : > { %p2208_p10 = pnand %p2206_p4, %p2431_p2  ;;  %p2214_p7 = scmp.lt.s32.totalorder %s2212_s6, %s2205_s28 }
  0x69   : > { %p2209_p13 = pneg %p2208_p10  ;;  %p2215_p3 = por %p2214_p7, %p2213_p9 }
  0x6b   : > { %p2216_p5 = pnand %p2215_p3, %p2209_p13 }
  0x6d   : > { %2219 = shalt.err (!%p2216_p5)
}
  0x6e   : > { %2061 = dma.hbm_to_vmem [thread:$0]  (!%p2413_p0), %s2506_s23, 1024, %s2510_s0, %s2425_s11, %s2312_s19, %s2312_s19, %s2313_s29  }
  0x6f   : > { %p2863_p2 = scmp.ne.s32.totalorder %s2860_s30, 0 }
  0x70   : > { %s2540_s20 = sand.u32 (!%p2863_p2), 1, %s2290_s13   ;;  %p2864_p1 = scmp.ne.s32.totalorder (!%p2863_p2), %s2854_s24, 0 }
  0x71   : > { %241 = sbr.rel (%p2863_p2) target bundleno = 695 (0x2b7), region = 32  ;;  %s1418_s21 = sshll.u32 (!%p2863_p2), %s2540_s20, 6 }
  0x72   : > { %s244_s9 = scalar_lea.sflag (!%p2863_p2), [#allocation3], %s2540_s20  ;;  %s2546_s4 = scalar_lea.vmem (!%p2863_p2), [#allocation2], %s1418_s21 }
  0x78   : > { %2273 = dma.done.wait (%p2864_p1), %s244_s9, 1024  }
  0x79   : > { %2275 = vsyncadd (%p2864_p1), %s244_s9, 4294966272  ;;  %s252_s0 = sand.u32 1, %s2369_s18   ;;  %s2042_s11 = smul.u32 384, %s2540_s20 }
  0x7a   : > { %s253_s30 = scalar_lea.sflag [#allocation6], %s252_s0 }
  0x7b   : > { %s2556_s19 = scalar_lea.vmem [#allocation5], %s2042_s11 }
  0x7c   : > { %2277 = dma.done.wait (%p2864_p1), %s253_s30, 7168  }
  0x7d   : > { %2279 = vsyncadd (%p2864_p1), %s253_s30, 4294960128  ;;  %v351_v0 = vld [vmem:[%s2556_s19] sm:$0xff]  ;;  %v352_v1 = vld [vmem:[%s2556_s19 + $0x8] sm:$0xff]  ;;  %s2584_s18 = scalar_lea.vmem [#allocation7], %s1418_s21  ;;  %s2736_s24 = scalar_lea.vmem [#allocation8], %s2042_s11 }
  0x7e   : > { %v353_v2 = vld [vmem:[%s2556_s19 + $0x10] sm:$0xff]  ;;  %v367_v3 = vpack.c.bf16 %v352_v1, %v351_v0  ;;  %v354_v4 = vld [vmem:[%s2556_s19 + $0x18] sm:$0xff]  ;;  %v355_v6 = vld [vmem:[%s2556_s19 + $0x20] sm:$0xff]  ;;  %s2043_s29 = smul.u32 6144, %s2298_s15  ;;  %s1268_s23 = sshll.u32 %s2736_s24, 4  ;;  %s2791_s23 = int_to_ptr.vmem [resolvable:$true] %s1268_s23 }
  0x7f   : > { %v368_v5 = vpack.c.bf16 %v354_v4, %v353_v2  ;;  %v356_v7 = vld [vmem:[%s2556_s19 + $0x28] sm:$0xff]  ;;  %v357_v8 = vld [vmem:[%s2556_s19 + $0x30] sm:$0xff]  ;;  %v358_v10 = vld [vmem:[%s2556_s19 + $0x38] sm:$0xff]  ;;  %s1250_s15 = scalar_lea.sflag [#allocation4], %s2540_s20  ;;  %s2220_s7 = scalar_lea.vmem %s2791_s23, 6144 }
  0x80   : > { %1680 = vmatprep.subr.bf16.mxu0 %v367_v3  ;;  %v369_v9 = vpack.c.bf16 %v356_v7, %v355_v6  ;;  %v2571_v11 = vld [vmem:[%s2546_s4] sm:$0xff]   ;;  %v370_v12 = vpack.c.bf16 %v358_v10, %v357_v8  ;;  %v360_v14 = vld [vmem:[%s2556_s19 + $0x48] sm:$0xff]  ;;  %v361_v16 = vld [vmem:[%s2556_s19 + $0x50] sm:$0xff]  ;;  %s2789_s8 = scalar_lea.hbm %s2845_s3, %s2043_s29  ;;  %p2221_p0 = scmp.ne.s32.totalorder %s2791_s23, %s2220_s7 }
  0x81   : > { %1681 = vmatpush3.bf16.msra.mxu0 %v367_v3  ;;  %1696 = vmatprep.mubr.bf16.mxu0 %v2571_v11  ;;  %v359_v13 = vld [vmem:[%s2556_s19 + $0x40] sm:$0xff]  ;;  %v362_v17 = vld [vmem:[%s2556_s19 + $0x58] sm:$0xff]  ;;  %v364_v20 = vld [vmem:[%s2556_s19 + $0x68] sm:$0xff]  ;;  %p2865_p6 = scmp.ne.s32.totalorder %s2855_s25, 0  ;;  %s2315_s28 = smov [#allocation8]  }
  0x82   : > { %1682 = vmatprep.subr.bf16.mxu0 %v368_v5  ;;  %v371_v15 = vpack.c.bf16 %v360_v14, %v359_v13  ;;  %v372_v18 = vpack.c.bf16 %v362_v17, %v361_v16  ;;  %v363_v19 = vld [vmem:[%s2556_s19 + $0x60] sm:$0xff]  ;;  %v365_v22 = vld [vmem:[%s2556_s19 + $0x70] sm:$0xff]  ;;  %v366_v23 = vld [vmem:[%s2556_s19 + $0x78] sm:$0xff]  ;;  %s2224_s5 = sshll.u32 %s2315_s28, 4  ;;  %s2225_s5 = int_to_ptr.vmem [resolvable:$false] %s2224_s5 }
  0x83   : > { %v373_v21 = vpack.c.bf16 %v364_v20, %v363_v19  ;;  %v2587_v24 = vld [vmem:[%s2584_s18] sm:$0xff]   ;;  %v2590_v25 = vld [vmem:[%s2584_s18 + $0x8] sm:$0xff]   ;;  %v374_v26 = vpack.c.bf16 %v366_v23, %v365_v22  ;;  %v2598_v29 = vld [vmem:[%s2584_s18 + $0x10] sm:$0xff]   ;;  %p2222_p12 = pnand %p2221_p0, %p2865_p6  ;;  %s2226_s1 = scalar_lea.vmem %s2225_s5, 12288 }
  0x84   : > { %1945 = vmatprep.subr.bf16.mxu1 %v2587_v24  ;;  %v1428_v27 = vld [vmem:[%s2556_s19 + $0x80] sm:$0xff]  ;;  %v1429_v28 = vld [vmem:[%s2556_s19 + $0x88] sm:$0xff]  ;;  %v1430_v31 = vld [vmem:[%s2556_s19 + $0x90] sm:$0xff]  ;;  %p2227_p11 = scmp.lt.s32.totalorder %s2791_s23, %s2225_s5  ;;  %p2228_p4 = scmp.lt.s32.totalorder %s2226_s1, %s2220_s7 }
  0x85   : > { %1683 = vmatpush3.bf16.msra.mxu0 %v368_v5  ;;  %1947 = vmatpush3.bf16.msra.mxu1 %v2587_v24  ;;  %v698_v30 = vpack.c.bf16 %v1429_v28, %v1428_v27  ;;  %v1431_v32 = vld [vmem:[%s2556_s19 + $0x98] sm:$0xff]  ;;  %v2604_v33 = vld [vmem:[%s2546_s4 + $0x8] sm:$0xff]   ;;  %v2608_v34 = vld [vmem:[%s2546_s4 + $0x10] sm:$0xff]   ;;  %p2223_p8 = pneg %p2222_p12 }
  0x86   : > { %1684 = vmatprep.subr.bf16.mxu0 %v369_v9  ;;  %1949 = vmatprep.subr.bf16.mxu1 %v2590_v25  ;;  %v2611_v35 = vld [vmem:[%s2584_s18 + $0x18] sm:$0xff]   ;;  %v699_v36 = vpack.c.bf16 %v1431_v32, %v1430_v31  ;;  %v1432_v37 = vld [vmem:[%s2556_s19 + $0xa0] sm:$0xff]  ;;  %v1433_v38 = vld [vmem:[%s2556_s19 + $0xa8] sm:$0xff]  ;;  %p2229_p10 = por %p2228_p4, %p2227_p11 }
  0x87   : > { %v2620_v39 = vld [vmem:[%s2584_s18 + $0x20] sm:$0xff]   ;;  %v700_v40 = vpack.c.bf16 %v1433_v38, %v1432_v37  ;;  %v1434_v41 = vld [vmem:[%s2556_s19 + $0xb0] sm:$0xff]  ;;  %v1435_v42 = vld [vmem:[%s2556_s19 + $0xb8] sm:$0xff] }
  0x88   : > { %v2626_v43 = vld [vmem:[%s2546_s4 + $0x18] sm:$0xff]   ;;  %v2630_v44 = vld [vmem:[%s2546_s4 + $0x20] sm:$0xff]   ;;  %v2633_v45 = vld [vmem:[%s2584_s18 + $0x28] sm:$0xff]   ;;  %v701_v46 = vpack.c.bf16 %v1435_v42, %v1434_v41  ;;  %p2230_p13 = pnand %p2229_p10, %p2223_p8 }
  0x89   : > { %1685 = vmatpush3.bf16.msra.mxu0 %v369_v9  ;;  %1951 = vmatpush3.bf16.msra.mxu1 %v2590_v25  ;;  %v1436_v47 = vld [vmem:[%s2556_s19 + $0xc0] sm:$0xff]  ;;  %v1437_v48 = vld [vmem:[%s2556_s19 + $0xc8] sm:$0xff]  ;;  %v2642_v49 = vld [vmem:[%s2584_s18 + $0x30] sm:$0xff]  }
  0x8a   : > { %1686 = vmatprep.subr.bf16.mxu0 %v370_v12  ;;  %1953 = vmatprep.subr.bf16.mxu1 %v2598_v29  ;;  %v702_v50 = vpack.c.bf16 %v1437_v48, %v1436_v47  ;;  %v1438_v51 = vld [vmem:[%s2556_s19 + $0xd0] sm:$0xff]  ;;  %v1439_v52 = vld [vmem:[%s2556_s19 + $0xd8] sm:$0xff]  ;;  %v2648_v53 = vld [vmem:[%s2546_s4 + $0x28] sm:$0xff]  }
  0x8b   : > { %v2652_v54 = vld [vmem:[%s2546_s4 + $0x30] sm:$0xff]   ;;  %v703_v55 = vpack.c.bf16 %v1439_v52, %v1438_v51  ;;  %v1440_v56 = vld [vmem:[%s2556_s19 + $0xe0] sm:$0xff]  ;;  %v1441_v57 = vld [vmem:[%s2556_s19 + $0xe8] sm:$0xff] }
  0x8c   : > { %v704_v58 = vpack.c.bf16 %v1441_v57, %v1440_v56  ;;  %v1442_v59 = vld [vmem:[%s2556_s19 + $0xf0] sm:$0xff]  ;;  %v1443_v60 = vld [vmem:[%s2556_s19 + $0xf8] sm:$0xff]  ;;  %v1460_v63 = vld [vmem:[%s2556_s19 + $0x100] sm:$0xff] }
  0x8d   : > { %1687 = vmatpush3.bf16.msra.mxu0 %v370_v12  ;;  %1955 = vmatpush3.bf16.msra.mxu1 %v2598_v29  ;;  %v2662_v61 = vld [vmem:[%s2546_s4 + $0x38] sm:$0xff]   ;;  %v705_v62 = vpack.c.bf16 %v1443_v60, %v1442_v59  ;;  %v1461_v0 = vld [vmem:[%s2556_s19 + $0x108] sm:$0xff]  ;;  %v1462_v2 = vld [vmem:[%s2556_s19 + $0x110] sm:$0xff] }
  0x8e   : > { %1688 = vmatprep.subr.bf16.mxu0 %v371_v15  ;;  %1957 = vmatprep.subr.bf16.mxu1 %v2611_v35  ;;  %v982_v1 = vpack.c.bf16 %v1461_v0, %v1460_v63  ;;  %v1463_v3 = vld [vmem:[%s2556_s19 + $0x118] sm:$0xff]  ;;  %v1464_v5 = vld [vmem:[%s2556_s19 + $0x120] sm:$0xff]  ;;  %v1465_v6 = vld [vmem:[%s2556_s19 + $0x128] sm:$0xff] }
  0x8f   : > { %v983_v4 = vpack.c.bf16 %v1463_v3, %v1462_v2  ;;  %v984_v7 = vpack.c.bf16 %v1465_v6, %v1464_v5  ;;  %v1466_v8 = vld [vmem:[%s2556_s19 + $0x130] sm:$0xff]  ;;  %v1467_v9 = vld [vmem:[%s2556_s19 + $0x138] sm:$0xff]  ;;  %v1468_v12 = vld [vmem:[%s2556_s19 + $0x140] sm:$0xff] }
  0x90   : > { %v985_v10 = vpack.c.bf16 %v1467_v9, %v1466_v8  ;;  %v1469_v13 = vld [vmem:[%s2556_s19 + $0x148] sm:$0xff]  ;;  %v1471_v16 = vld [vmem:[%s2556_s19 + $0x158] sm:$0xff] }
  0x91   : > { %1689 = vmatpush3.bf16.msra.mxu0 %v371_v15  ;;  %1959 = vmatpush3.bf16.msra.mxu1 %v2611_v35  ;;  %v986_v14 = vpack.c.bf16 %v1469_v13, %v1468_v12  ;;  %v1470_v15 = vld [vmem:[%s2556_s19 + $0x150] sm:$0xff]  ;;  %v1473_v19 = vld [vmem:[%s2556_s19 + $0x168] sm:$0xff]  ;;  %v1475_v22 = vld [vmem:[%s2556_s19 + $0x178] sm:$0xff] }
  0x92   : > { %1690 = vmatprep.subr.bf16.mxu0 %v372_v18  ;;  %1961 = vmatprep.subr.bf16.mxu1 %v2620_v39  ;;  %v987_v17 = vpack.c.bf16 %v1471_v16, %v1470_v15 }
  0x95   : > { %1691 = vmatpush3.bf16.msra.mxu0 %v372_v18  ;;  %1963 = vmatpush3.bf16.msra.mxu1 %v2620_v39  ;;  %v1472_v18 = vld [vmem:[%s2556_s19 + $0x160] sm:$0xff] }
  0x96   : > { %1692 = vmatprep.subr.bf16.mxu0 %v373_v21  ;;  %1965 = vmatprep.subr.bf16.mxu1 %v2633_v45  ;;  %v988_v20 = vpack.c.bf16 %v1473_v19, %v1472_v18 }
  0x99   : > { %1693 = vmatpush3.bf16.msra.mxu0 %v373_v21  ;;  %1967 = vmatpush3.bf16.msra.mxu1 %v2633_v45  ;;  %v1474_v21 = vld [vmem:[%s2556_s19 + $0x170] sm:$0xff] }
  0x9a   : > { %1694 = vmatprep.subr.bf16.mxu0 %v374_v26  ;;  %1969 = vmatprep.subr.bf16.mxu1 %v2642_v49  ;;  %v989_v23 = vpack.c.bf16 %v1475_v22, %v1474_v21 }
  0x9d   : > { %1695 = vmatpush3.bf16.msra.mxu0 %v374_v26  ;;  %1971 = vmatpush3.bf16.msra.mxu1 %v2642_v49  ;;  %v2697_v26 = vld [vmem:[%s2584_s18 + $0x38] sm:$0xff]  }
  0x9e   : > { %1768 = vmatprep.subr.bf16.mxu0 %v698_v30  ;;  %1973 = vmatprep.subr.bf16.mxu1 %v2697_v26 }
  0xa0   : > { %1697 = vmatmul.mubr.bf16.vlgmr.msra.gmra.mrb[0].mxu0 %v2604_v33 }
  0xa1   : > { %1769 = vmatpush3.bf16.msra.mxu0 %v698_v30  ;;  %1700 = vmatprep.mubr.bf16.mxu0 %v2608_v34 }
  0xa2   : > { %1770 = vmatprep.subr.bf16.mxu0 %v699_v36  ;;  %1975 = vmatpush3.bf16.msra.mxu1 %v2697_v26 }
  0xa3   : > { %1977 = vmatprep.subr.bf16.mxu1 %v2587_v24 }
  0xa5   : > { %1771 = vmatpush3.bf16.msra.mxu0 %v699_v36 }
  0xa6   : > { %1772 = vmatprep.subr.bf16.mxu0 %v700_v40 }
  0xa8   : > { %1701 = vmatmul.mubr.bf16.gmra.mrb[4].mxu0 %v2626_v43 }
  0xa9   : > { %1773 = vmatpush3.bf16.msra.mxu0 %v700_v40  ;;  %1704 = vmatprep.mubr.bf16.mxu0 %v2630_v44 }
  0xaa   : > { %1774 = vmatprep.subr.bf16.mxu0 %v701_v46 }
  0xad   : > { %1775 = vmatpush3.bf16.msra.mxu0 %v701_v46 }
  0xae   : > { %1776 = vmatprep.subr.bf16.mxu0 %v702_v50 }
  0xb0   : > { %1705 = vmatmul.mubr.bf16.gmra.mrb[8].mxu0 %v2648_v53 }
  0xb1   : > { %1777 = vmatpush3.bf16.msra.mxu0 %v702_v50  ;;  %1708 = vmatprep.mubr.bf16.mxu0 %v2652_v54 }
  0xb2   : > { %1778 = vmatprep.subr.bf16.mxu0 %v703_v55 }
  0xb5   : > { %1779 = vmatpush3.bf16.msra.mxu0 %v703_v55 }
  0xb6   : > { %1780 = vmatprep.subr.bf16.mxu0 %v704_v58 }
  0xb8   : > { %1709 = vmatmul.mubr.bf16.gmra.mrb[12].mxu0 %v2662_v61 }
  0xb9   : > { %1781 = vmatpush3.bf16.msra.mxu0 %v704_v58  ;;  %1784 = vmatprep.mubr.bf16.mxu0 %v2571_v11 }
  0xba   : > { %1782 = vmatprep.subr.bf16.mxu0 %v705_v62 }
  0xbd   : > { %1783 = vmatpush3.bf16.msra.mxu0 %v705_v62 }
  0xbe   : > { %1856 = vmatprep.subr.bf16.mxu0 %v982_v1 }
  0xc0   : > { %1785 = vmatmul.mubr.bf16.vlgmr.msra.gmra.mrb[16].mxu0 %v2604_v33 }
  0xc1   : > { %1857 = vmatpush3.bf16.msra.mxu0 %v982_v1  ;;  %1788 = vmatprep.mubr.bf16.mxu0 %v2608_v34 }
  0xc2   : > { %1858 = vmatprep.subr.bf16.mxu0 %v983_v4 }
  0xc5   : > { %1859 = vmatpush3.bf16.msra.mxu0 %v983_v4 }
  0xc6   : > { %1860 = vmatprep.subr.bf16.mxu0 %v984_v7 }
  0xc8   : > { %1789 = vmatmul.mubr.bf16.gmra.mrb[20].mxu0 %v2626_v43 }
  0xc9   : > { %1861 = vmatpush3.bf16.msra.mxu0 %v984_v7  ;;  %1792 = vmatprep.mubr.bf16.mxu0 %v2630_v44 }
  0xca   : > { %1862 = vmatprep.subr.bf16.mxu0 %v985_v10 }
  0xcd   : > { %1863 = vmatpush3.bf16.msra.mxu0 %v985_v10 }
  0xce   : > { %1864 = vmatprep.subr.bf16.mxu0 %v986_v14 }
  0xd0   : > { %1793 = vmatmul.mubr.bf16.gmra.mrb[24].mxu0 %v2648_v53 }
  0xd1   : > { %1865 = vmatpush3.bf16.msra.mxu0 %v986_v14  ;;  %1796 = vmatprep.mubr.bf16.mxu0 %v2652_v54 }
  0xd2   : > { %1866 = vmatprep.subr.bf16.mxu0 %v987_v17 }
  0xd5   : > { %1867 = vmatpush3.bf16.msra.mxu0 %v987_v17 }
  0xd6   : > { %1868 = vmatprep.subr.bf16.mxu0 %v988_v20 }
  0xd8   : > { %1797 = vmatmul.mubr.bf16.gmra.mrb[28].mxu0 %v2662_v61 }
  0xd9   : > { %1869 = vmatpush3.bf16.msra.mxu0 %v988_v20  ;;  %1872 = vmatprep.mubr.bf16.mxu0 %v2571_v11 }
  0xda   : > { %1870 = vmatprep.subr.bf16.mxu0 %v989_v23 }
  0xdd   : > { %1871 = vmatpush3.bf16.msra.mxu0 %v989_v23 }
  0xe0   : > { %1873 = vmatmul.mubr.bf16.vlgmr.msra.gmra.mrb[32].mxu0 %v2604_v33 }
  0xe1   : > { %1876 = vmatprep.mubr.bf16.mxu0 %v2608_v34 }
  0xe8   : > { %1877 = vmatmul.mubr.bf16.gmra.mrb[36].mxu0 %v2626_v43 }
  0xe9   : > { %1880 = vmatprep.mubr.bf16.mxu0 %v2630_v44 }
  0xf0   : > { %1881 = vmatmul.mubr.bf16.gmra.mrb[40].mxu0 %v2648_v53 }
  0xf1   : > { %1884 = vmatprep.mubr.bf16.mxu0 %v2652_v54 }
  0xf8   : > { %1885 = vmatmul.mubr.bf16.gmra.mrb[44].mxu0 %v2662_v61 }
 0x173   : > { %v1698_v11 = vpop.f32.mrb[0].mxu0 }
 0x174   : > { %v457_v27 = vpop.f32.mrb[1].mxu0 }
 0x175   : > { %v1699_v28 = vpop.f32.mrb[2].mxu0  ;;  %1744 = vmatprep.mubr.f32.mxu1 %v457_v27 }
 0x176   : > { %v460_v30 = vpop.f32.mrb[3].mxu0 }
 0x177   : > { %1745 = vmatmul.mubr.f32.vlgmr.msra.gmra.mrb[0].mxu1 %v460_v30 }
 0x178   : > { %1747 = vmatprep.mubr.f32.mxu1 %v1698_v11  ;;  %1979 = vmatpush3.bf16.msra.mxu1 %v2587_v24 }
 0x179   : > { %1981 = vmatprep.subr.bf16.mxu1 %v2590_v25 }
 0x17b   : > { %v1702_v31 = vpop.f32.mrb[4].mxu0  ;;  %1748 = vmatmul.mubr.f32.gmra.mrb[2].mxu1 %v1699_v28 }
 0x17c   : > { %v473_v32 = vpop.f32.mrb[5].mxu0  ;;  %1983 = vmatpush3.bf16.msra.mxu1 %v2590_v25 }
 0x17d   : > { %v1703_v33 = vpop.f32.mrb[6].mxu0  ;;  %1750 = vmatprep.mubr.f32.mxu1 %v473_v32  ;;  %1985 = vmatprep.subr.bf16.mxu1 %v2598_v29 }
 0x17e   : > { %v476_v34 = vpop.f32.mrb[7].mxu0 }
 0x17f   : > { %1751 = vmatmul.mubr.f32.gmra.mrb[4].mxu1 %v476_v34 }
 0x180   : > { %1753 = vmatprep.mubr.f32.mxu1 %v1702_v31  ;;  %1987 = vmatpush3.bf16.msra.mxu1 %v2598_v29 }
 0x181   : > { %1989 = vmatprep.subr.bf16.mxu1 %v2611_v35 }
 0x183   : > { %v1706_v36 = vpop.f32.mrb[8].mxu0  ;;  %1754 = vmatmul.mubr.f32.gmra.mrb[6].mxu1 %v1703_v33 }
 0x184   : > { %v489_v37 = vpop.f32.mrb[9].mxu0  ;;  %1991 = vmatpush3.bf16.msra.mxu1 %v2611_v35 }
 0x185   : > { %v1707_v38 = vpop.f32.mrb[10].mxu0  ;;  %1756 = vmatprep.mubr.f32.mxu1 %v489_v37  ;;  %1993 = vmatprep.subr.bf16.mxu1 %v2620_v39 }
 0x186   : > { %v492_v40 = vpop.f32.mrb[11].mxu0 }
 0x187   : > { %1757 = vmatmul.mubr.f32.gmra.mrb[8].mxu1 %v492_v40 }
 0x188   : > { %1759 = vmatprep.mubr.f32.mxu1 %v1706_v36  ;;  %1995 = vmatpush3.bf16.msra.mxu1 %v2620_v39 }
 0x189   : > { %1997 = vmatprep.subr.bf16.mxu1 %v2633_v45 }
 0x18b   : > { %v1710_v41 = vpop.f32.mrb[12].mxu0  ;;  %1760 = vmatmul.mubr.f32.gmra.mrb[10].mxu1 %v1707_v38 }
 0x18c   : > { %v505_v42 = vpop.f32.mrb[13].mxu0  ;;  %1999 = vmatpush3.bf16.msra.mxu1 %v2633_v45 }
 0x18d   : > { %v1711_v43 = vpop.f32.mrb[14].mxu0  ;;  %1762 = vmatprep.mubr.f32.mxu1 %v505_v42  ;;  %2001 = vmatprep.subr.bf16.mxu1 %v2642_v49 }
 0x18e   : > { %v508_v44 = vpop.f32.mrb[15].mxu0 }
 0x18f   : > { %1763 = vmatmul.mubr.f32.gmra.mrb[12].mxu1 %v508_v44 }
 0x190   : > { %1765 = vmatprep.mubr.f32.mxu1 %v1710_v41  ;;  %2003 = vmatpush3.bf16.msra.mxu1 %v2642_v49 }
 0x191   : > { %2005 = vmatprep.subr.bf16.mxu1 %v2697_v26 }
 0x193   : > { %1766 = vmatmul.mubr.f32.gmra.mrb[14].mxu1 %v1711_v43  ;;  %v1786_v46 = vpop.f32.mrb[16].mxu0 }
 0x194   : > { %v740_v47 = vpop.f32.mrb[17].mxu0  ;;  %2007 = vmatpush3.bf16.msra.mxu1 %v2697_v26 }
 0x195   : > { %v1787_v48 = vpop.f32.mrb[18].mxu0  ;;  %1832 = vmatprep.mubr.f32.mxu1 %v740_v47  ;;  %2009 = vmatprep.subr.bf16.mxu1 %v2587_v24 }
 0x196   : > { %v743_v50 = vpop.f32.mrb[19].mxu0 }
 0x197   : > { %1833 = vmatmul.mubr.f32.vlgmr.msra.gmra.mrb[16].mxu1 %v743_v50 }
 0x198   : > { %1835 = vmatprep.mubr.f32.mxu1 %v1786_v46  ;;  %2011 = vmatpush3.bf16.msra.mxu1 %v2587_v24 }
 0x199   : > { %2013 = vmatprep.subr.bf16.mxu1 %v2590_v25 }
 0x19b   : > { %v1790_v51 = vpop.f32.mrb[20].mxu0  ;;  %1836 = vmatmul.mubr.f32.gmra.mrb[18].mxu1 %v1787_v48 }
 0x19c   : > { %v756_v52 = vpop.f32.mrb[21].mxu0  ;;  %2015 = vmatpush3.bf16.msra.mxu1 %v2590_v25 }
 0x19d   : > { %v1791_v53 = vpop.f32.mrb[22].mxu0  ;;  %1838 = vmatprep.mubr.f32.mxu1 %v756_v52  ;;  %2017 = vmatprep.subr.bf16.mxu1 %v2598_v29 }
 0x19e   : > { %v759_v54 = vpop.f32.mrb[23].mxu0 }
 0x19f   : > { %1839 = vmatmul.mubr.f32.gmra.mrb[20].mxu1 %v759_v54 }
 0x1a0   : > { %1841 = vmatprep.mubr.f32.mxu1 %v1790_v51  ;;  %2019 = vmatpush3.bf16.msra.mxu1 %v2598_v29 }
 0x1a1   : > { %2021 = vmatprep.subr.bf16.mxu1 %v2611_v35 }
 0x1a3   : > { %v1794_v55 = vpop.f32.mrb[24].mxu0  ;;  %1842 = vmatmul.mubr.f32.gmra.mrb[22].mxu1 %v1791_v53 }
 0x1a4   : > { %v772_v24 = vpop.f32.mrb[25].mxu0  ;;  %2023 = vmatpush3.bf16.msra.mxu1 %v2611_v35 }
 0x1a5   : > { %v1795_v56 = vpop.f32.mrb[26].mxu0  ;;  %1844 = vmatprep.mubr.f32.mxu1 %v772_v24  ;;  %2025 = vmatprep.subr.bf16.mxu1 %v2620_v39 }
 0x1a6   : > { %v775_v25 = vpop.f32.mrb[27].mxu0 }
 0x1a7   : > { %1845 = vmatmul.mubr.f32.gmra.mrb[24].mxu1 %v775_v25 }
 0x1a8   : > { %1847 = vmatprep.mubr.f32.mxu1 %v1794_v55  ;;  %2027 = vmatpush3.bf16.msra.mxu1 %v2620_v39 }
 0x1a9   : > { %2029 = vmatprep.subr.bf16.mxu1 %v2633_v45 }
 0x1ab   : > { %v1798_v57 = vpop.f32.mrb[28].mxu0  ;;  %1848 = vmatmul.mubr.f32.gmra.mrb[26].mxu1 %v1795_v56 }
 0x1ac   : > { %v788_v29 = vpop.f32.mrb[29].mxu0  ;;  %2031 = vmatpush3.bf16.msra.mxu1 %v2633_v45 }
 0x1ad   : > { %v1799_v58 = vpop.f32.mrb[30].mxu0  ;;  %1850 = vmatprep.mubr.f32.mxu1 %v788_v29  ;;  %2033 = vmatprep.subr.bf16.mxu1 %v2642_v49 }
 0x1ae   : > { %v791_v35 = vpop.f32.mrb[31].mxu0 }
 0x1af   : > { %1851 = vmatmul.mubr.f32.gmra.mrb[28].mxu1 %v791_v35 }
 0x1b0   : > { %1853 = vmatprep.mubr.f32.mxu1 %v1798_v57  ;;  %2035 = vmatpush3.bf16.msra.mxu1 %v2642_v49 }
 0x1b1   : > { %2037 = vmatprep.subr.bf16.mxu1 %v2697_v26 }
 0x1b3   : > { %1854 = vmatmul.mubr.f32.gmra.mrb[30].mxu1 %v1799_v58  ;;  %v1874_v39 = vpop.f32.mrb[32].mxu0 }
 0x1b4   : > { %v1024_v59 = vpop.f32.mrb[33].mxu0  ;;  %2039 = vmatpush3.bf16.msra.mxu1 %v2697_v26 }
 0x1b5   : > { %v1875_v60 = vpop.f32.mrb[34].mxu0  ;;  %1920 = vmatprep.mubr.f32.mxu1 %v1024_v59 }
 0x1b6   : > { %v1027_v61 = vpop.f32.mrb[35].mxu0 }
 0x1b7   : > { %1921 = vmatmul.mubr.f32.vlgmr.msra.gmra.mrb[32].mxu1 %v1027_v61 }
 0x1b8   : > { %1923 = vmatprep.mubr.f32.mxu1 %v1874_v39 }
 0x1bb   : > { %v1878_v45 = vpop.f32.mrb[36].mxu0  ;;  %1924 = vmatmul.mubr.f32.gmra.mrb[34].mxu1 %v1875_v60 }
 0x1bc   : > { %v1040_v62 = vpop.f32.mrb[37].mxu0 }
 0x1bd   : > { %v1879_v63 = vpop.f32.mrb[38].mxu0  ;;  %1926 = vmatprep.mubr.f32.mxu1 %v1040_v62 }
 0x1be   : > { %v1043_v0 = vpop.f32.mrb[39].mxu0 }
 0x1bf   : > { %1927 = vmatmul.mubr.f32.gmra.mrb[36].mxu1 %v1043_v0 }
 0x1c0   : > { %1929 = vmatprep.mubr.f32.mxu1 %v1878_v45 }
 0x1c3   : > { %v1882_v49 = vpop.f32.mrb[40].mxu0  ;;  %1930 = vmatmul.mubr.f32.gmra.mrb[38].mxu1 %v1879_v63 }
 0x1c4   : > { %v1056_v1 = vpop.f32.mrb[41].mxu0 }
 0x1c5   : > { %v1883_v2 = vpop.f32.mrb[42].mxu0  ;;  %1932 = vmatprep.mubr.f32.mxu1 %v1056_v1 }
 0x1c6   : > { %v1059_v3 = vpop.f32.mrb[43].mxu0 }
 0x1c7   : > { %1933 = vmatmul.mubr.f32.gmra.mrb[40].mxu1 %v1059_v3 }
 0x1c8   : > { %1935 = vmatprep.mubr.f32.mxu1 %v1882_v49 }
 0x1cb   : > { %v1886_v4 = vpop.f32.mrb[44].mxu0  ;;  %1936 = vmatmul.mubr.f32.gmra.mrb[42].mxu1 %v1883_v2 }
 0x1cc   : > { %v1072_v5 = vpop.f32.mrb[45].mxu0 }
 0x1cd   : > { %v1887_v6 = vpop.f32.mrb[46].mxu0  ;;  %1938 = vmatprep.mubr.f32.mxu1 %v1072_v5 }
 0x1ce   : > { %v1075_v7 = vpop.f32.mrb[47].mxu0 }
 0x1cf   : > { %1939 = vmatmul.mubr.f32.gmra.mrb[44].mxu1 %v1075_v7 }
 0x1d0   : > { %1941 = vmatprep.mubr.f32.mxu1 %v1886_v4 }
 0x1d3   : > { %1942 = vmatmul.mubr.f32.gmra.mrb[46].mxu1 %v1887_v6 }
 0x24a   : > { %v1746_v8 = vpop.f32.mrb[0].mxu1 }
 0x24b   : > { %666 = vst [vmem:[%s2736_s24 + $0x8] sm:$0xff] %v1746_v8  ;;  %v586_v9 = vpop.f32.mrb[1].mxu1 }
 0x24c   : > { %665 = vst [vmem:[%s2736_s24] sm:$0xff] %v586_v9 }
 0x24e   : > { %v1749_v10 = vpop.f32.mrb[2].mxu1 }
 0x24f   : > { %668 = vst [vmem:[%s2736_s24 + $0x18] sm:$0xff] %v1749_v10  ;;  %v596_v12 = vpop.f32.mrb[3].mxu1 }
 0x250   : > { %667 = vst [vmem:[%s2736_s24 + $0x10] sm:$0xff] %v596_v12 }
 0x252   : > { %v1752_v13 = vpop.f32.mrb[4].mxu1 }
 0x253   : > { %670 = vst [vmem:[%s2736_s24 + $0x28] sm:$0xff] %v1752_v13  ;;  %v606_v14 = vpop.f32.mrb[5].mxu1 }
 0x254   : > { %669 = vst [vmem:[%s2736_s24 + $0x20] sm:$0xff] %v606_v14 }
 0x256   : > { %v1755_v15 = vpop.f32.mrb[6].mxu1 }
 0x257   : > { %672 = vst [vmem:[%s2736_s24 + $0x38] sm:$0xff] %v1755_v15  ;;  %v616_v16 = vpop.f32.mrb[7].mxu1 }
 0x258   : > { %671 = vst [vmem:[%s2736_s24 + $0x30] sm:$0xff] %v616_v16 }
 0x25a   : > { %v1758_v17 = vpop.f32.mrb[8].mxu1 }
 0x25b   : > { %674 = vst [vmem:[%s2736_s24 + $0x48] sm:$0xff] %v1758_v17  ;;  %v626_v18 = vpop.f32.mrb[9].mxu1 }
 0x25c   : > { %673 = vst [vmem:[%s2736_s24 + $0x40] sm:$0xff] %v626_v18 }
 0x25e   : > { %v1761_v19 = vpop.f32.mrb[10].mxu1 }
 0x25f   : > { %676 = vst [vmem:[%s2736_s24 + $0x58] sm:$0xff] %v1761_v19  ;;  %v636_v20 = vpop.f32.mrb[11].mxu1 }
 0x260   : > { %675 = vst [vmem:[%s2736_s24 + $0x50] sm:$0xff] %v636_v20 }
 0x262   : > { %v1764_v21 = vpop.f32.mrb[12].mxu1 }
 0x263   : > { %678 = vst [vmem:[%s2736_s24 + $0x68] sm:$0xff] %v1764_v21  ;;  %v646_v22 = vpop.f32.mrb[13].mxu1 }
 0x264   : > { %677 = vst [vmem:[%s2736_s24 + $0x60] sm:$0xff] %v646_v22 }
 0x266   : > { %v1767_v23 = vpop.f32.mrb[14].mxu1 }
 0x267   : > { %680 = vst [vmem:[%s2736_s24 + $0x78] sm:$0xff] %v1767_v23  ;;  %v656_v26 = vpop.f32.mrb[15].mxu1 }
 0x268   : > { %679 = vst [vmem:[%s2736_s24 + $0x70] sm:$0xff] %v656_v26 }
 0x26a   : > { %v1834_v11 = vpop.f32.mrb[16].mxu1 }
 0x26b   : > { %1445 = vst [vmem:[%s2736_s24 + $0x88] sm:$0xff] %v1834_v11  ;;  %v869_v27 = vpop.f32.mrb[17].mxu1 }
 0x26c   : > { %1444 = vst [vmem:[%s2736_s24 + $0x80] sm:$0xff] %v869_v27 }
 0x26e   : > { %v1837_v28 = vpop.f32.mrb[18].mxu1 }
 0x26f   : > { %1447 = vst [vmem:[%s2736_s24 + $0x98] sm:$0xff] %v1837_v28  ;;  %v879_v30 = vpop.f32.mrb[19].mxu1 }
 0x270   : > { %1446 = vst [vmem:[%s2736_s24 + $0x90] sm:$0xff] %v879_v30 }
 0x272   : > { %v1840_v31 = vpop.f32.mrb[20].mxu1 }
 0x273   : > { %1449 = vst [vmem:[%s2736_s24 + $0xa8] sm:$0xff] %v1840_v31  ;;  %v889_v32 = vpop.f32.mrb[21].mxu1 }
 0x274   : > { %1448 = vst [vmem:[%s2736_s24 + $0xa0] sm:$0xff] %v889_v32 }
 0x276   : > { %v1843_v33 = vpop.f32.mrb[22].mxu1 }
 0x277   : > { %1451 = vst [vmem:[%s2736_s24 + $0xb8] sm:$0xff] %v1843_v33  ;;  %v899_v34 = vpop.f32.mrb[23].mxu1 }
 0x278   : > { %1450 = vst [vmem:[%s2736_s24 + $0xb0] sm:$0xff] %v899_v34 }
 0x27a   : > { %v1846_v36 = vpop.f32.mrb[24].mxu1 }
 0x27b   : > { %1453 = vst [vmem:[%s2736_s24 + $0xc8] sm:$0xff] %v1846_v36  ;;  %v909_v37 = vpop.f32.mrb[25].mxu1 }
 0x27c   : > { %1452 = vst [vmem:[%s2736_s24 + $0xc0] sm:$0xff] %v909_v37 }
 0x27e   : > { %v1849_v38 = vpop.f32.mrb[26].mxu1 }
 0x27f   : > { %1455 = vst [vmem:[%s2736_s24 + $0xd8] sm:$0xff] %v1849_v38  ;;  %v919_v40 = vpop.f32.mrb[27].mxu1 }
 0x280   : > { %1454 = vst [vmem:[%s2736_s24 + $0xd0] sm:$0xff] %v919_v40 }
 0x282   : > { %v1852_v41 = vpop.f32.mrb[28].mxu1 }
 0x283   : > { %1457 = vst [vmem:[%s2736_s24 + $0xe8] sm:$0xff] %v1852_v41  ;;  %v929_v42 = vpop.f32.mrb[29].mxu1 }
 0x284   : > { %1456 = vst [vmem:[%s2736_s24 + $0xe0] sm:$0xff] %v929_v42 }
 0x286   : > { %v1855_v43 = vpop.f32.mrb[30].mxu1 }
 0x287   : > { %1459 = vst [vmem:[%s2736_s24 + $0xf8] sm:$0xff] %v1855_v43  ;;  %v939_v44 = vpop.f32.mrb[31].mxu1 }
 0x288   : > { %1458 = vst [vmem:[%s2736_s24 + $0xf0] sm:$0xff] %v939_v44 }
 0x28a   : > { %v1922_v46 = vpop.f32.mrb[32].mxu1 }
 0x28b   : > { %1477 = vst [vmem:[%s2736_s24 + $0x108] sm:$0xff] %v1922_v46  ;;  %v1153_v47 = vpop.f32.mrb[33].mxu1 }
 0x28c   : > { %1476 = vst [vmem:[%s2736_s24 + $0x100] sm:$0xff] %v1153_v47 }
 0x28e   : > { %v1925_v48 = vpop.f32.mrb[34].mxu1 }
 0x28f   : > { %1479 = vst [vmem:[%s2736_s24 + $0x118] sm:$0xff] %v1925_v48  ;;  %v1163_v50 = vpop.f32.mrb[35].mxu1 }
 0x290   : > { %1478 = vst [vmem:[%s2736_s24 + $0x110] sm:$0xff] %v1163_v50 }
 0x292   : > { %v1928_v51 = vpop.f32.mrb[36].mxu1 }
 0x293   : > { %1481 = vst [vmem:[%s2736_s24 + $0x128] sm:$0xff] %v1928_v51  ;;  %v1173_v52 = vpop.f32.mrb[37].mxu1 }
 0x294   : > { %1480 = vst [vmem:[%s2736_s24 + $0x120] sm:$0xff] %v1173_v52 }
 0x296   : > { %v1931_v53 = vpop.f32.mrb[38].mxu1 }
 0x297   : > { %1483 = vst [vmem:[%s2736_s24 + $0x138] sm:$0xff] %v1931_v53  ;;  %v1183_v54 = vpop.f32.mrb[39].mxu1 }
 0x298   : > { %1482 = vst [vmem:[%s2736_s24 + $0x130] sm:$0xff] %v1183_v54 }
 0x29a   : > { %v1934_v55 = vpop.f32.mrb[40].mxu1 }
 0x29b   : > { %1485 = vst [vmem:[%s2736_s24 + $0x148] sm:$0xff] %v1934_v55  ;;  %v1193_v24 = vpop.f32.mrb[41].mxu1 }
 0x29c   : > { %1484 = vst [vmem:[%s2736_s24 + $0x140] sm:$0xff] %v1193_v24 }
 0x29e   : > { %v1937_v56 = vpop.f32.mrb[42].mxu1 }
 0x29f   : > { %1487 = vst [vmem:[%s2736_s24 + $0x158] sm:$0xff] %v1937_v56  ;;  %v1203_v25 = vpop.f32.mrb[43].mxu1 }
 0x2a0   : > { %1486 = vst [vmem:[%s2736_s24 + $0x150] sm:$0xff] %v1203_v25 }
 0x2a2   : > { %v1940_v57 = vpop.f32.mrb[44].mxu1 }
 0x2a3   : > { %1489 = vst [vmem:[%s2736_s24 + $0x168] sm:$0xff] %v1940_v57  ;;  %v1213_v29 = vpop.f32.mrb[45].mxu1 }
 0x2a4   : > { %1488 = vst [vmem:[%s2736_s24 + $0x160] sm:$0xff] %v1213_v29 }
 0x2a6   : > { %v1943_v58 = vpop.f32.mrb[46].mxu1 }
 0x2a7   : > { %1491 = vst [vmem:[%s2736_s24 + $0x178] sm:$0xff] %v1943_v58  ;;  %v1223_v35 = vpop.f32.mrb[47].mxu1 }
 0x2a8   : > { %1490 = vst [vmem:[%s2736_s24 + $0x170] sm:$0xff] %v1223_v35 }
 0x2a9   : > { %2233 = shalt.err (!%p2230_p13)
}
 0x2aa   : > { %s2234_s6 = scalar_lea.hbm %s2789_s8, 6144  ;;  %s2238_s4 = scalar_lea.hbm %s2845_s3, 12288 }
 0x2ab   : > { %p2235_p9 = scmp.ne.s32.totalorder %s2789_s8, %s2234_s6  ;;  %p2239_p5 = scmp.lt.u32.totalorder %s2789_s8, %s2845_s3 }
 0x2ac   : > { %p2240_p2 = scmp.lt.u32.totalorder %s2238_s4, %s2234_s6  ;;  %p2242_p0 = scmp.lt.u32.totalorder %s2234_s6, %s2789_s8 }
 0x2ad   : > { %p2236_p7 = pnand %p2235_p9, %p2865_p6 }
 0x2ae   : > { %p2241_p1 = por %p2240_p2, %p2239_p5 }
 0x2af   : > { %p2237_p3 = pneg %p2236_p7 }
 0x2b0   : > { %p2243_p12 = por %p2242_p0, %p2241_p1 }
 0x2b2   : > { %p2244_p8 = pnand %p2243_p12, %p2237_p3 }
 0x2b4   : > { %2247 = shalt.err (!%p2244_p8)
}
 0x2b5   : > { %s2316_s30 = smov 128   ;;  %s2317_s19 = smov 8  }
 0x2b6   : > { %2050 = dma.vmem_to_hbm [thread:$0]  (%p2865_p6), %s2791_s23, 6144, %s2789_s8, %s1250_s15, %s2316_s30, %s2316_s30, %s2317_s19  }
 0x2b7 PF: > { %s1283_s18 = sand.u32 1, %s2286_s12   ;;  %p2866_p11 = scmp.ne.s32.totalorder %s2856_s27, 0 }
 0x2b8   : > { %p2867_p4 = scmp.ge.s32.totalorder %s2306_s17, 2  ;;  %s1284_s24 = scalar_lea.sflag [#allocation4], %s1283_s18 }
 0x2ba   : > { %p2063_p10 = pnand %p2867_p4, %p2866_p11 }
 0x2bc   : > { %2281 = dma.done.wait (!%p2063_p10), %s1284_s24, 6144  }
 0x2bd   : > { %2283 = vsyncadd (!%p2063_p10), %s1284_s24, 4294961152  ;;  %s22_s17 = sadd.s32 1, %s2306_s17   ;;  %s2868_s25 = sld [smem:[#allocation12_spill]] }
 0x2be   : > { %p19_p13 = scmp.ge.s32.totalorder %s22_s17, 4   ;;  %s2869_s12 = smov %s2290_s13 }
 0x2bf   : > { %s2870_s13 = smov %s2294_s14  ;;  %s2871_s14 = smov %s2398_s26 }
 0x2c0   : > { %s2872_s15 = smov %s2302_s16  ;;  %21 = sbr.rel (!%p19_p13) target bundleno = 11 (0xb), region = 105 }
 0x2c3   : > { %s2873_s16 = smov %s2868_s25 }
 0x2c7   :  { %1289 = vsyncpa [#allocation3], 1 }
 0x2c8   :  { %1291 = vsyncpa [#allocation3 + $0x1], 1 }
 0x2c9   :  { %1292 = vsyncpa [#allocation6], 1 }
 0x2ca   :  { %1294 = vsyncpa [#allocation6 + $0x1], 1 }
 0x2cb   :  { %1295 = vsyncpa [#allocation4], 1 }
 0x2cc   :  { %1297 = vsyncpa [#allocation4 + $0x1], 1 }

</bundles_post_ra>
